<compile_context>
chip_gen: v7x
topology: tpu7x:2x2x1
jax: 0.10.0
libtpu: 0.0.40
codegen_flags: <defaults>
</compile_context>

<pallas_src>
import jax
import jax.numpy as jnp
from jax.experimental import pallas as pl
from jax.experimental.pallas import tpu as pltpu

GCN_DEPTH = 2
HOP_ALPHA = 0.05
OUT_DIM = 16


# ----------------------------- Pallas kernel --------------------------------

def _build_kernel(B, N, Ls, Os):
    L1, L2, L3 = Ls
    O1, O2 = Os

    def kernel(x1, t1, bm1, we1, w1d1, b1d1,
               x2, t2, bm2, we2, w1d2, b1d2,
               x3, t3, bm3, we3, bend3,
               o_ref):
        def sgcn(x_ref, t_ref, bm_ref, we_ref):
            # Fused mixprop hops + concat + 1x1 channel mix: one bf16 matmul.
            y = jnp.dot(t_ref[...], x_ref[...],
                        preferred_element_type=jnp.float32)      # (N*C, B*L)
            y = jnp.maximum(y + bm_ref[...], 0.0)                 # bias + ReLU
            # C -> 1 conv per node: kron(I_N, wend^T) @ y
            return jnp.dot(we_ref[...], y,
                           preferred_element_type=jnp.float32)    # (N, B*L)

        z1 = sgcn(x1, t1, bm1, we1)          # (N, B*L1)
        z2 = sgcn(x2, t2, bm2, we2)          # (N, B*L2)
        z3 = sgcn(x3, t3, bm3, we3)          # (N, B*L3)
        bend = bend3[0]                      # scalar from SMEM

        for b in range(B):                   # B=2, fully unrolled
            h1 = jnp.dot(z1[:, b * L1:(b + 1) * L1], w1d1[...],
                         preferred_element_type=jnp.float32) + b1d1[...]
            h2 = jnp.dot(z2[:, b * L2:(b + 1) * L2], w1d2[...],
                         preferred_element_type=jnp.float32) + b1d2[...]
            r = slice(b * N, (b + 1) * N)
            o_ref[r, 0:O1] = h1
            o_ref[r, O1:O1 + O2] = h2
            o_ref[r, O1 + O2:O1 + O2 + L3] = z3[:, b * L3:(b + 1) * L3] + bend

    return kernel


# ------------------------------ JAX wrapper ----------------------------------

def _hop_matrices(adj):
    """M_k such that h_k = M_k @ x for the mixprop recursion (row-normalized A+I)."""
    N = adj.shape[0]
    a = adj + jnp.eye(N, dtype=jnp.float32)
    a = a / a.sum(axis=1, keepdims=True)
    eye = jnp.eye(N, dtype=jnp.float32)
    ms, m = [eye], eye
    for _ in range(GCN_DEPTH):
        m = HOP_ALPHA * eye + (1.0 - HOP_ALPHA) * jnp.matmul(
            a, m, precision=jax.lax.Precision.HIGHEST)
        ms.append(m)
    return ms


def _prep_level(x_nchw, p, ms):
    B, C, N, L = x_nchw.shape
    # (B, C, N, L) -> rows (n, c), lanes (b, l):  (N*C, B*L)
    x_alt = jnp.transpose(x_nchw, (2, 1, 0, 3)).reshape(N * C, B * L)
    # Fused hop-propagation + per-hop channel mix operator.
    t = sum(jnp.kron(ms[k], p['wmlp'][k].T) for k in range(GCN_DEPTH + 1))
    bmlp_col = jnp.tile(p['bmlp'].reshape(C, 1), (N, 1))                 # (N*C, 1)
    we_t = jnp.kron(jnp.eye(N, dtype=jnp.float32),
                    p['wend'].reshape(1, C))                             # (N, N*C)
    return (x_alt.astype(jnp.bfloat16), t.astype(jnp.bfloat16),
            bmlp_col.astype(jnp.float32), we_t.astype(jnp.float32))


def _prep_head(p):
    w1d = p['w1d'].astype(jnp.float32)                                   # (L, 16)
    # Fold the C->1 conv bias (bend) into the Conv1d bias.
    b1d_eff = p['b1d'] + p['bend'].reshape(1, 1) * w1d.sum(axis=0, keepdims=True)
    return w1d, b1d_eff.astype(jnp.float32)


def wave_gcn_forward(wf1, wf2, wf3, adj, params):
    B, _, N, L1 = wf1.shape
    L2 = wf2.shape[3]
    L3 = wf3.shape[3]
    O1 = params['l1']['w1d'].shape[1]
    O2 = params['l2']['w1d'].shape[1]
    TOT = O1 + O2 + L3

    ms = _hop_matrices(adj.astype(jnp.float32))
    x1, t1, bm1, we1 = _prep_level(wf1, params['l1'], ms)
    x2, t2, bm2, we2 = _prep_level(wf2, params['l2'], ms)
    x3, t3, bm3, we3 = _prep_level(wf3, params['l3'], ms)
    w1d1, b1d1 = _prep_head(params['l1'])
    w1d2, b1d2 = _prep_head(params['l2'])
    bend3 = params['l3']['bend'].reshape(1).astype(jnp.float32)

    kernel = _build_kernel(B, N, (L1, L2, L3), (O1, O2))
    vmem = pl.BlockSpec(memory_space=pltpu.MemorySpace.VMEM)
    smem = pl.BlockSpec(memory_space=pltpu.MemorySpace.SMEM)

    out = pl.pallas_call(
        kernel,
        out_shape=jax.ShapeDtypeStruct((B * N, TOT), jnp.float32),
        in_specs=[vmem] * 16 + [smem],
        out_specs=vmem,
    )(x1, t1, bm1, we1, w1d1, b1d1,
      x2, t2, bm2, we2, w1d2, b1d2,
      x3, t3, bm3, we3, bend3)

    out = out.reshape(B, N, TOT)
    return [out[:, :, :O1], out[:, :, O1:O1 + O2], out[:, :, O1 + O2:]]


# -------------------------------- params -------------------------------------

def init_params(key):
    ks = jax.random.split(key, 16)
    nrm = lambda k, shape, s=0.2: (s * jax.random.normal(k, shape)).astype(jnp.float32)

    def level_params(keys, C, L=None, out=None):
        p = {'wmlp': nrm(keys[0], (GCN_DEPTH + 1, C, C)),
             'bmlp': nrm(keys[1], (1, C)),
             'wend': nrm(keys[2], (C, 1)),
             'bend': nrm(keys[3], (1, 1))}
        if L is not None:
            p['w1d'] = nrm(keys[4], (L, out))
            p['b1d'] = nrm(keys[5], (1, out))
        return p

    return {'l1': level_params(ks[0:6], 8, 64, OUT_DIM),
            'l2': level_params(ks[6:12], 16, 32, OUT_DIM),
            'l3': level_params(ks[12:16], 32)}


# --------------------------- pure-JAX reference -------------------------------

def ref_forward(wf1, wf2, wf3, adj, params):
    hp = jax.lax.Precision.HIGHEST
    N = adj.shape[0]
    a = adj + jnp.eye(N, dtype=adj.dtype)
    a = a / a.sum(axis=1, keepdims=True)

    def level(x, p, head):
        B, C, _, L = x.shape
        h = x
        outs = [h]
        for _ in range(GCN_DEPTH):
            h = HOP_ALPHA * x + (1 - HOP_ALPHA) * jnp.einsum(
                'bcwl,vw->bcvl', h, a, precision=hp)
            outs.append(h)
        ho = jnp.concatenate(outs, axis=1)                      # (B, 3C, N, L)
        y = jnp.einsum('bcnl,cd->bdnl', ho, p['wmlp'].reshape(-1, C),
                       precision=hp) + p['bmlp'].reshape(1, C, 1, 1)
        y = jnp.maximum(y, 0.0)
        z = jnp.einsum('bdnl,do->bonl', y, p['wend'],
                       precision=hp) + p['bend'].reshape(1, 1, 1, 1)
        z = z[:, 0]                                             # (B, N, L)
        if not head:
            return z
        return jnp.einsum('bnl,lo->bno', z, p['w1d'],
                          precision=hp) + p['b1d'].reshape(1, 1, -1)

    return [level(wf1, params['l1'], True),
            level(wf2, params['l2'], True),
            level(wf3, params['l3'], False)]


# ---------------------------------- main --------------------------------------

if __name__ == "__main__":
    key = jax.random.PRNGKey(0)
    kp, k1, k2, k3, ka = jax.random.split(key, 5)
    B, N = 2, 8
    # seq lengths forced by the Conv1d heads (in_channels 64 / 32); L3 free.
    wf1 = (0.5 * jax.random.normal(k1, (B, 8, N, 64))).astype(jnp.float32)
    wf2 = (0.5 * jax.random.normal(k2, (B, 16, N, 32))).astype(jnp.float32)
    wf3 = (0.5 * jax.random.normal(k3, (B, 32, N, 16))).astype(jnp.float32)
    adj = jax.random.uniform(ka, (N, N), dtype=jnp.float32)

    params = init_params(kp)

    fwd = jax.jit(wave_gcn_forward)
    outs = fwd(wf1, wf2, wf3, adj, params)
    outs = [jax.block_until_ready(o) for o in outs]

    refs = ref_forward(wf1, wf2, wf3, adj, params)
    for o, r in zip(outs, refs):
        assert o.shape == r.shape, (o.shape, r.shape)
        assert jnp.allclose(o, r, rtol=5e-2, atol=5e-2), \
            float(jnp.max(jnp.abs(o - r)))

    print("KERNEL_OK")
</pallas_src>

<mosaic_0001>
module attributes {stable_mosaic.version = 11 : i64} {
  func.func @kernel(%arg0: memref<64x128xbf16, #tpu.memory_space<vmem>>, %arg1: memref<64x64xbf16, #tpu.memory_space<vmem>>, %arg2: memref<64x1xf32, #tpu.memory_space<vmem>>, %arg3: memref<8x64xf32, #tpu.memory_space<vmem>>, %arg4: memref<64x16xf32, #tpu.memory_space<vmem>>, %arg5: memref<1x16xf32, #tpu.memory_space<vmem>>, %arg6: memref<128x64xbf16, #tpu.memory_space<vmem>>, %arg7: memref<128x128xbf16, #tpu.memory_space<vmem>>, %arg8: memref<128x1xf32, #tpu.memory_space<vmem>>, %arg9: memref<8x128xf32, #tpu.memory_space<vmem>>, %arg10: memref<32x16xf32, #tpu.memory_space<vmem>>, %arg11: memref<1x16xf32, #tpu.memory_space<vmem>>, %arg12: memref<256x32xbf16, #tpu.memory_space<vmem>>, %arg13: memref<256x256xbf16, #tpu.memory_space<vmem>>, %arg14: memref<256x1xf32, #tpu.memory_space<vmem>>, %arg15: memref<8x256xf32, #tpu.memory_space<vmem>>, %arg16: memref<1xf32, #tpu.memory_space<smem>>, %arg17: memref<16x48xf32, #tpu.memory_space<vmem>>) attributes {dimension_semantics = [], scalar_prefetch = 0 : i64, scratch_operands = 0 : i64, tpu.core_type = #tpu.core_type<tc>} {
    %c0 = arith.constant 0 : index
    %c0_0 = arith.constant 0 : index
    %0 = vector.load %arg1[%c0, %c0_0] : memref<64x64xbf16, #tpu.memory_space<vmem>>, vector<64x64xbf16>
    %c0_1 = arith.constant 0 : index
    %c0_2 = arith.constant 0 : index
    %1 = vector.load %arg0[%c0_1, %c0_2] : memref<64x128xbf16, #tpu.memory_space<vmem>>, vector<64x128xbf16>
    %cst = arith.constant dense<0.000000e+00> : vector<64x128xf32>
    %2 = tpu.matmul %0, %1, %cst {dimension_numbers = #tpu.dot_dimension_numbers<[1], [0], [0], [1], [0, 0, 1, 1], [], []>} : vector<64x64xbf16>, vector<64x128xbf16>, vector<64x128xf32> -> vector<64x128xf32>
    %c0_3 = arith.constant 0 : index
    %c0_4 = arith.constant 0 : index
    %3 = vector.load %arg2[%c0_3, %c0_4] : memref<64x1xf32, #tpu.memory_space<vmem>>, vector<64x1xf32>
    %4 = vector.broadcast %3 : vector<64x1xf32> to vector<64x128xf32>
    %5 = arith.addf %2, %4 : vector<64x128xf32>
    %cst_5 = arith.constant 0.000000e+00 : f32
    %6 = vector.broadcast %cst_5 : f32 to vector<64x128xf32>
    %7 = arith.maximumf %5, %6 : vector<64x128xf32>
    %c0_6 = arith.constant 0 : index
    %c0_7 = arith.constant 0 : index
    %8 = vector.load %arg3[%c0_6, %c0_7] : memref<8x64xf32, #tpu.memory_space<vmem>>, vector<8x64xf32>
    %cst_8 = arith.constant dense<0.000000e+00> : vector<8x128xf32>
    %9 = tpu.matmul %8, %7, %cst_8 {dimension_numbers = #tpu.dot_dimension_numbers<[1], [0], [0], [1], [0, 0, 1, 1], [], []>} : vector<8x64xf32>, vector<64x128xf32>, vector<8x128xf32> -> vector<8x128xf32>
    %c0_9 = arith.constant 0 : index
    %c0_10 = arith.constant 0 : index
    %10 = vector.load %arg7[%c0_9, %c0_10] : memref<128x128xbf16, #tpu.memory_space<vmem>>, vector<128x128xbf16>
    %c0_11 = arith.constant 0 : index
    %c0_12 = arith.constant 0 : index
    %11 = vector.load %arg6[%c0_11, %c0_12] : memref<128x64xbf16, #tpu.memory_space<vmem>>, vector<128x64xbf16>
    %cst_13 = arith.constant dense<0.000000e+00> : vector<128x64xf32>
    %12 = tpu.matmul %10, %11, %cst_13 {dimension_numbers = #tpu.dot_dimension_numbers<[1], [0], [0], [1], [0, 0, 1, 1], [], []>} : vector<128x128xbf16>, vector<128x64xbf16>, vector<128x64xf32> -> vector<128x64xf32>
    %c0_14 = arith.constant 0 : index
    %c0_15 = arith.constant 0 : index
    %13 = vector.load %arg8[%c0_14, %c0_15] : memref<128x1xf32, #tpu.memory_space<vmem>>, vector<128x1xf32>
    %14 = vector.broadcast %13 : vector<128x1xf32> to vector<128x64xf32>
    %15 = arith.addf %12, %14 : vector<128x64xf32>
    %cst_16 = arith.constant 0.000000e+00 : f32
    %16 = vector.broadcast %cst_16 : f32 to vector<128x64xf32>
    %17 = arith.maximumf %15, %16 : vector<128x64xf32>
    %c0_17 = arith.constant 0 : index
    %c0_18 = arith.constant 0 : index
    %18 = vector.load %arg9[%c0_17, %c0_18] : memref<8x128xf32, #tpu.memory_space<vmem>>, vector<8x128xf32>
    %cst_19 = arith.constant dense<0.000000e+00> : vector<8x64xf32>
    %19 = tpu.matmul %18, %17, %cst_19 {dimension_numbers = #tpu.dot_dimension_numbers<[1], [0], [0], [1], [0, 0, 1, 1], [], []>} : vector<8x128xf32>, vector<128x64xf32>, vector<8x64xf32> -> vector<8x64xf32>
    %c0_20 = arith.constant 0 : index
    %c0_21 = arith.constant 0 : index
    %20 = vector.load %arg13[%c0_20, %c0_21] : memref<256x256xbf16, #tpu.memory_space<vmem>>, vector<256x256xbf16>
    %c0_22 = arith.constant 0 : index
    %c0_23 = arith.constant 0 : index
    %21 = vector.load %arg12[%c0_22, %c0_23] : memref<256x32xbf16, #tpu.memory_space<vmem>>, vector<256x32xbf16>
    %cst_24 = arith.constant dense<0.000000e+00> : vector<256x32xf32>
    %22 = tpu.matmul %20, %21, %cst_24 {dimension_numbers = #tpu.dot_dimension_numbers<[1], [0], [0], [1], [0, 0, 1, 1], [], []>} : vector<256x256xbf16>, vector<256x32xbf16>, vector<256x32xf32> -> vector<256x32xf32>
    %c0_25 = arith.constant 0 : index
    %c0_26 = arith.constant 0 : index
    %23 = vector.load %arg14[%c0_25, %c0_26] : memref<256x1xf32, #tpu.memory_space<vmem>>, vector<256x1xf32>
    %24 = vector.broadcast %23 : vector<256x1xf32> to vector<256x32xf32>
    %25 = arith.addf %22, %24 : vector<256x32xf32>
    %cst_27 = arith.constant 0.000000e+00 : f32
    %26 = vector.broadcast %cst_27 : f32 to vector<256x32xf32>
    %27 = arith.maximumf %25, %26 : vector<256x32xf32>
    %c0_28 = arith.constant 0 : index
    %c0_29 = arith.constant 0 : index
    %28 = vector.load %arg15[%c0_28, %c0_29] : memref<8x256xf32, #tpu.memory_space<vmem>>, vector<8x256xf32>
    %cst_30 = arith.constant dense<0.000000e+00> : vector<8x32xf32>
    %29 = tpu.matmul %28, %27, %cst_30 {dimension_numbers = #tpu.dot_dimension_numbers<[1], [0], [0], [1], [0, 0, 1, 1], [], []>} : vector<8x256xf32>, vector<256x32xf32>, vector<8x32xf32> -> vector<8x32xf32>
    %c0_31 = arith.constant 0 : index
    %30 = memref.load %arg16[%c0_31] : memref<1xf32, #tpu.memory_space<smem>>
    %31 = vector.extract_strided_slice %9 {offsets = [0, 0], sizes = [8, 64], strides = [1, 1]} : vector<8x128xf32> to vector<8x64xf32>
    %c0_32 = arith.constant 0 : index
    %c0_33 = arith.constant 0 : index
    %32 = vector.load %arg4[%c0_32, %c0_33] : memref<64x16xf32, #tpu.memory_space<vmem>>, vector<64x16xf32>
    %cst_34 = arith.constant dense<0.000000e+00> : vector<8x16xf32>
    %33 = tpu.matmul %31, %32, %cst_34 {dimension_numbers = #tpu.dot_dimension_numbers<[1], [0], [0], [1], [0, 0, 1, 1], [], []>} : vector<8x64xf32>, vector<64x16xf32>, vector<8x16xf32> -> vector<8x16xf32>
    %c0_35 = arith.constant 0 : index
    %c0_36 = arith.constant 0 : index
    %34 = vector.load %arg5[%c0_35, %c0_36] : memref<1x16xf32, #tpu.memory_space<vmem>>, vector<1x16xf32>
    %35 = vector.broadcast %34 : vector<1x16xf32> to vector<8x16xf32>
    %36 = arith.addf %33, %35 : vector<8x16xf32>
    %37 = vector.extract_strided_slice %19 {offsets = [0, 0], sizes = [8, 32], strides = [1, 1]} : vector<8x64xf32> to vector<8x32xf32>
    %c0_37 = arith.constant 0 : index
    %c0_38 = arith.constant 0 : index
    %38 = vector.load %arg10[%c0_37, %c0_38] : memref<32x16xf32, #tpu.memory_space<vmem>>, vector<32x16xf32>
    %cst_39 = arith.constant dense<0.000000e+00> : vector<8x16xf32>
    %39 = tpu.matmul %37, %38, %cst_39 {dimension_numbers = #tpu.dot_dimension_numbers<[1], [0], [0], [1], [0, 0, 1, 1], [], []>} : vector<8x32xf32>, vector<32x16xf32>, vector<8x16xf32> -> vector<8x16xf32>
    %c0_40 = arith.constant 0 : index
    %c0_41 = arith.constant 0 : index
    %40 = vector.load %arg11[%c0_40, %c0_41] : memref<1x16xf32, #tpu.memory_space<vmem>>, vector<1x16xf32>
    %41 = vector.broadcast %40 : vector<1x16xf32> to vector<8x16xf32>
    %42 = arith.addf %39, %41 : vector<8x16xf32>
    %c0_42 = arith.constant 0 : index
    %c0_43 = arith.constant 0 : index
    %43 = vector.load %arg17[%c0_42, %c0_43] : memref<16x48xf32, #tpu.memory_space<vmem>>, vector<8x16xf32>
    tpu.vector_store %arg17[%c0_42, %c0_43], %36 {strides = array<i32>} : memref<16x48xf32, #tpu.memory_space<vmem>>, vector<8x16xf32>,
    %c0_44 = arith.constant 0 : index
    %c16 = arith.constant 16 : index
    %44 = vector.load %arg17[%c0_44, %c16] : memref<16x48xf32, #tpu.memory_space<vmem>>, vector<8x16xf32>
    tpu.vector_store %arg17[%c0_44, %c16], %42 {strides = array<i32>} : memref<16x48xf32, #tpu.memory_space<vmem>>, vector<8x16xf32>,
    %45 = vector.extract_strided_slice %29 {offsets = [0, 0], sizes = [8, 16], strides = [1, 1]} : vector<8x32xf32> to vector<8x16xf32>
    %46 = vector.broadcast %30 : f32 to vector<8x16xf32>
    %47 = arith.addf %45, %46 : vector<8x16xf32>
    %c0_45 = arith.constant 0 : index
    %c32 = arith.constant 32 : index
    %48 = vector.load %arg17[%c0_45, %c32] : memref<16x48xf32, #tpu.memory_space<vmem>>, vector<8x16xf32>
    tpu.vector_store %arg17[%c0_45, %c32], %47 {strides = array<i32>} : memref<16x48xf32, #tpu.memory_space<vmem>>, vector<8x16xf32>,
    %49 = vector.extract_strided_slice %9 {offsets = [0, 64], sizes = [8, 64], strides = [1, 1]} : vector<8x128xf32> to vector<8x64xf32>
    %c0_46 = arith.constant 0 : index
    %c0_47 = arith.constant 0 : index
    %50 = vector.load %arg4[%c0_46, %c0_47] : memref<64x16xf32, #tpu.memory_space<vmem>>, vector<64x16xf32>
    %cst_48 = arith.constant dense<0.000000e+00> : vector<8x16xf32>
    %51 = tpu.matmul %49, %50, %cst_48 {dimension_numbers = #tpu.dot_dimension_numbers<[1], [0], [0], [1], [0, 0, 1, 1], [], []>} : vector<8x64xf32>, vector<64x16xf32>, vector<8x16xf32> -> vector<8x16xf32>
    %c0_49 = arith.constant 0 : index
    %c0_50 = arith.constant 0 : index
    %52 = vector.load %arg5[%c0_49, %c0_50] : memref<1x16xf32, #tpu.memory_space<vmem>>, vector<1x16xf32>
    %53 = vector.broadcast %52 : vector<1x16xf32> to vector<8x16xf32>
    %54 = arith.addf %51, %53 : vector<8x16xf32>
    %55 = vector.extract_strided_slice %19 {offsets = [0, 32], sizes = [8, 32], strides = [1, 1]} : vector<8x64xf32> to vector<8x32xf32>
    %c0_51 = arith.constant 0 : index
    %c0_52 = arith.constant 0 : index
    %56 = vector.load %arg10[%c0_51, %c0_52] : memref<32x16xf32, #tpu.memory_space<vmem>>, vector<32x16xf32>
    %cst_53 = arith.constant dense<0.000000e+00> : vector<8x16xf32>
    %57 = tpu.matmul %55, %56, %cst_53 {dimension_numbers = #tpu.dot_dimension_numbers<[1], [0], [0], [1], [0, 0, 1, 1], [], []>} : vector<8x32xf32>, vector<32x16xf32>, vector<8x16xf32> -> vector<8x16xf32>
    %c0_54 = arith.constant 0 : index
    %c0_55 = arith.constant 0 : index
    %58 = vector.load %arg11[%c0_54, %c0_55] : memref<1x16xf32, #tpu.memory_space<vmem>>, vector<1x16xf32>
    %59 = vector.broadcast %58 : vector<1x16xf32> to vector<8x16xf32>
    %60 = arith.addf %57, %59 : vector<8x16xf32>
    %c8 = arith.constant 8 : index
    %c0_56 = arith.constant 0 : index
    %61 = vector.load %arg17[%c8, %c0_56] : memref<16x48xf32, #tpu.memory_space<vmem>>, vector<8x16xf32>
    tpu.vector_store %arg17[%c8, %c0_56], %54 {strides = array<i32>} : memref<16x48xf32, #tpu.memory_space<vmem>>, vector<8x16xf32>,
    %c8_57 = arith.constant 8 : index
    %c16_58 = arith.constant 16 : index
    %62 = vector.load %arg17[%c8_57, %c16_58] : memref<16x48xf32, #tpu.memory_space<vmem>>, vector<8x16xf32>
    tpu.vector_store %arg17[%c8_57, %c16_58], %60 {strides = array<i32>} : memref<16x48xf32, #tpu.memory_space<vmem>>, vector<8x16xf32>,
    %63 = vector.extract_strided_slice %29 {offsets = [0, 16], sizes = [8, 16], strides = [1, 1]} : vector<8x32xf32> to vector<8x16xf32>
    %64 = vector.broadcast %30 : f32 to vector<8x16xf32>
    %65 = arith.addf %63, %64 : vector<8x16xf32>
    %c8_59 = arith.constant 8 : index
    %c32_60 = arith.constant 32 : index
    %66 = vector.load %arg17[%c8_59, %c32_60] : memref<16x48xf32, #tpu.memory_space<vmem>>, vector<8x16xf32>
    tpu.vector_store %arg17[%c8_59, %c32_60], %65 {strides = array<i32>} : memref<16x48xf32, #tpu.memory_space<vmem>>, vector<8x16xf32>,
    return
  }
}

</mosaic_0001>

<bundles_post_ra>
// kernel: wave_gcn_forward.1
= control target key start
LH: loop header
LB: loop body
LE: loop exit
PB: predicated region body
PF: predicated region fallthrough
CT: control target
= control target key end

     0   :  { %v2563_v0 = vmov 0   ;;  %vm166_vm0 = vcmask 523264   ;;  %vm2565_vm1 = vmmov 0   ;;  %vm1611_vm2 = vcmask 261120   ;;  %s3315_s2 = inlined_call_operand.vmem [shape: f32[64,1], index: 2, kind: input, shape index: {}]   ;;  %s3316_s0 = inlined_call_operand.vmem [shape: bf16[64,128], index: 0, kind: input, shape index: {}]   ;;  %s3317_s1 = inlined_call_operand.vmem [shape: bf16[64,64], index: 1, kind: input, shape index: {}]   ;;  %s3318_s12 = inlined_call_operand.vmem [shape: bf16[256,32], index: 12, kind: input, shape index: {}]   ;;  %s3319_s8 = inlined_call_operand.vmem [shape: f32[128,1], index: 8, kind: input, shape index: {}]   ;;  %s3320_s13 = inlined_call_operand.vmem [shape: bf16[256,256], index: 13, kind: input, shape index: {}]   ;;  %s3321_s14 = inlined_call_operand.vmem [shape: f32[256,1], index: 14, kind: input, shape index: {}]   ;;  %s3322_s6 = inlined_call_operand.vmem [shape: bf16[128,64], index: 6, kind: input, shape index: {}]   ;;  %s3323_s7 = inlined_call_operand.vmem [shape: bf16[128,128], index: 7, kind: input, shape index: {}]   ;;  %s3324_s3 = inlined_call_operand.vmem [shape: f32[8,64], index: 3, kind: input, shape index: {}]   ;;  %s3325_s9 = inlined_call_operand.vmem [shape: f32[8,128], index: 9, kind: input, shape index: {}]   ;;  %s3326_s15 = inlined_call_operand.vmem [shape: f32[8,256], index: 15, kind: input, shape index: {}]   ;;  %s3327_s4 = inlined_call_operand.vmem [shape: f32[64,16], index: 4, kind: input, shape index: {}]   ;;  %s3328_s10 = inlined_call_operand.vmem [shape: f32[32,16], index: 10, kind: input, shape index: {}]   ;;  %s3329_s5 = inlined_call_operand.vmem [shape: f32[1,16], index: 5, kind: input, shape index: {}]   ;;  %s3330_s17 = inlined_call_operand.vmem [shape: f32[16,48], index: 17, kind: output, shape index: {}]   ;;  %s3331_s11 = inlined_call_operand.vmem [shape: f32[1,16], index: 11, kind: input, shape index: {}]   ;;  %s3332_s16 = inlined_call_operand.<no memory space> [shape: f32[1], index: 16, kind: input, shape index: {}]  }
   0x1   :  { %3335 = sst [smem:[#allocation3_spill]] %s3315_s2  ;;  %2474 = vset.pattern.permute.xlu1 %v2563_v0  ;;  %2473 = vset.pattern.permute.xlu0 %v2563_v0  ;;  %v2479_v11 = vld [vmem:[%s3317_s1] sm:$0xff]   ;;  %v359_v14 = vld [vmem:[%s3319_s8 + $0x8] sm:$0xff]  ;;  %v2485_v19 = vld [vmem:[%s3317_s1 + $0x10] sm:$0xff]   ;;  %vm1685_vm3 = vcmask 130048   ;;  %vm1691_vm4 = vcmask 261248  }
   0x2   :  { %3336 = sst [smem:[#allocation4_spill]] %s3316_s0  ;;  %s3337_s26 = sld [smem:[#allocation3_spill]]  ;;  %2207 = vmatprep.mubr.msk.bf16.mxu0 %vm166_vm0, %v2479_v11  ;;  %v358_v15 = vld [vmem:[%s3319_s8] sm:$0xff]  ;;  %v2480_v16 = vld [vmem:[%s3317_s1 + $0x8] sm:$0xff]   ;;  %v361_v20 = vld [vmem:[%s3319_s8 + $0x18] sm:$0xff]  ;;  %vm1699_vm5 = vcmask 392448  }
   0x3   :  { %s3338_s30 = sld [smem:[#allocation4_spill]]  ;;  %v2481_v17 = vld [vmem:[%s3318_s12 + $0x40] sm:$0xff]   ;;  %v360_v21 = vld [vmem:[%s3319_s8 + $0x10] sm:$0xff]  ;;  %v2483_v22 = vld [vmem:[%s3318_s12 + $0x48] sm:$0xff]  }
   0x4   :  { %v2482_v18 = vld [vmem:[%s3318_s12] sm:$0xff]   ;;  %v2484_v23 = vld [vmem:[%s3318_s12 + $0x8] sm:$0xff]   ;;  %v2487_v26 = vld [vmem:[%s3318_s12 + $0x50] sm:$0xff]  }
   0x5   :  { %v363_v24 = vld [vmem:[%s3319_s8 + $0x28] sm:$0xff]  ;;  %v362_v25 = vld [vmem:[%s3319_s8 + $0x20] sm:$0xff]  ;;  %v2486_v27 = vld [vmem:[%s3317_s1 + $0x18] sm:$0xff]  }
   0x6   :  { %v2488_v28 = vld [vmem:[%s3318_s12 + $0x10] sm:$0xff]   ;;  %v365_v29 = vld [vmem:[%s3319_s8 + $0x38] sm:$0xff]  ;;  %v367_v33 = vld [vmem:[%s3319_s8 + $0x48] sm:$0xff] }
   0x7   :  { %v364_v30 = vld [vmem:[%s3319_s8 + $0x30] sm:$0xff]  ;;  %v2489_v31 = vld [vmem:[%s3318_s12 + $0x58] sm:$0xff]   ;;  %v366_v34 = vld [vmem:[%s3319_s8 + $0x40] sm:$0xff] }
   0x8   :  { %v76_v1 = vld [vmem:[%s3337_s26 + $0x10] sm:$0xff]  ;;  %v74_v2 = vld [vmem:[%s3337_s26] sm:$0xff]  ;;  %v77_v4 = vld [vmem:[%s3337_s26 + $0x18] sm:$0xff] }
   0x9   :  { %94 = vperm.xlu1 %2474, %v76_v1   ;;  %84 = vperm.xlu0 %2473, %v74_v2   ;;  %v2475_v3 = vld [vmem:[%s3338_s30] sm:$0xff]   ;;  %v75_v5 = vld [vmem:[%s3337_s26 + $0x8] sm:$0xff]  ;;  %v2477_v9 = vld [vmem:[%s3338_s30 + $0x10] sm:$0xff]  }
   0xa   :  { %2199 = vmatprep.subr.bf16.mxu0 %v2475_v3  ;;  %v2476_v6 = vld [vmem:[%s3338_s30 + $0x8] sm:$0xff]   ;;  %v78_v8 = vld [vmem:[%s3337_s26 + $0x20] sm:$0xff]  ;;  %v81_v10 = vld [vmem:[%s3337_s26 + $0x38] sm:$0xff] }
   0xb   :  { %2200 = vmatpush3.bf16.msra.mxu0 %v2475_v3  ;;  %v79_v7 = vld [vmem:[%s3337_s26 + $0x28] sm:$0xff]  ;;  %v80_v12 = vld [vmem:[%s3337_s26 + $0x30] sm:$0xff]  ;;  %v2478_v13 = vld [vmem:[%s3338_s30 + $0x18] sm:$0xff]   ;;  %s2570_s30 = smov 32  }
   0xc   :  { %2201 = vmatprep.subr.bf16.mxu0 %v2476_v6  ;;  %v2490_v32 = vld [vmem:[%s3318_s12 + $0x18] sm:$0xff]   ;;  %v2491_v35 = vld [vmem:[%s3318_s12 + $0x60] sm:$0xff]   ;;  %v368_v39 = vld [vmem:[%s3319_s8 + $0x50] sm:$0xff] }
   0xd   :  { %99 = vperm.xlu1 %2474, %v77_v4   ;;  %89 = vperm.xlu0 %2473, %v75_v5   ;;  %v2492_v36 = vld [vmem:[%s3318_s12 + $0x20] sm:$0xff]   ;;  %v369_v38 = vld [vmem:[%s3319_s8 + $0x58] sm:$0xff]  ;;  %v2493_v40 = vld [vmem:[%s3318_s12 + $0x68] sm:$0xff]  }
   0xe   :  { %v2501_v37 = vld [vmem:[%s3320_s13 + $0x4] ss:$8 sps:$4 sm:$0xff]   ;;  %v2495_v44 = vld [vmem:[%s3318_s12 + $0x70] sm:$0xff]   ;;  %v373_v46 = vld [vmem:[%s3319_s8 + $0x78] sm:$0xff] }
   0xf   :  { %2202 = vmatpush3.bf16.msra.mxu0 %v2476_v6  ;;  %v2494_v41 = vld [vmem:[%s3318_s12 + $0x28] sm:$0xff]   ;;  %v370_v43 = vld [vmem:[%s3319_s8 + $0x60] sm:$0xff]  ;;  %v2496_v45 = vld [vmem:[%s3318_s12 + $0x30] sm:$0xff]  }
  0x10   :  { %2203 = vmatprep.subr.bf16.mxu0 %v2477_v9  ;;  %v371_v42 = vld [vmem:[%s3319_s8 + $0x68] sm:$0xff]  ;;  %v372_v47 = vld [vmem:[%s3319_s8 + $0x70] sm:$0xff]  ;;  %v2497_v48 = vld [vmem:[%s3318_s12 + $0x78] sm:$0xff]  }
  0x11   :  { %109 = vperm.xlu1 %2474, %v79_v7   ;;  %104 = vperm.xlu0 %2473, %v78_v8   ;;  %v2498_v49 = vld [vmem:[%s3318_s12 + $0x38] sm:$0xff]   ;;  %v815_v50 = vld [vmem:[%s3321_s14 + $0x88] sm:$0xff]  ;;  %v814_v51 = vld [vmem:[%s3321_s14 + $0x80] sm:$0xff] }
  0x12   :  { %v2499_v52 = vld [vmem:[%s3320_s13] ss:$8 sps:$4 sm:$0xff]   ;;  %v2502_v53 = vld [vmem:[%s3320_s13 + $0x14] ss:$8 sps:$4 sm:$0xff]   ;;  %v2504_v58 = vld [vmem:[%s3320_s13 + $0x10] ss:$8 sps:$4 sm:$0xff]  }
  0x13   :  { %2204 = vmatpush3.bf16.msra.mxu0 %v2477_v9  ;;  %v799_v54 = vld [vmem:[%s3321_s14 + $0x8] sm:$0xff]  ;;  %v798_v55 = vld [vmem:[%s3321_s14] sm:$0xff]  ;;  %v817_v56 = vld [vmem:[%s3321_s14 + $0x98] sm:$0xff] }
  0x14   :  { %2205 = vmatprep.subr.bf16.mxu0 %v2478_v13  ;;  %v816_v57 = vld [vmem:[%s3321_s14 + $0x90] sm:$0xff]  ;;  %v2505_v59 = vld [vmem:[%s3320_s13 + $0x24] ss:$8 sps:$4 sm:$0xff]   ;;  %v801_v60 = vld [vmem:[%s3321_s14 + $0x18] sm:$0xff] }
  0x15   :  { %119 = vperm.xlu1 %2474, %v81_v10   ;;  %114 = vperm.xlu0 %2473, %v80_v12   ;;  %v800_v61 = vld [vmem:[%s3321_s14 + $0x10] sm:$0xff]  ;;  %v819_v62 = vld [vmem:[%s3321_s14 + $0xa8] sm:$0xff]  ;;  %v818_v63 = vld [vmem:[%s3321_s14 + $0xa0] sm:$0xff] }
  0x16   :  { %v2507_v0 = vld [vmem:[%s3320_s13 + $0x20] ss:$8 sps:$4 sm:$0xff]   ;;  %v2508_v1 = vld [vmem:[%s3320_s13 + $0x34] ss:$8 sps:$4 sm:$0xff]   ;;  %v2510_v6 = vld [vmem:[%s3320_s13 + $0x30] ss:$8 sps:$4 sm:$0xff]  }
  0x17   :  { %2206 = vmatpush3.bf16.msra.mxu0 %v2478_v13  ;;  %v803_v2 = vld [vmem:[%s3321_s14 + $0x28] sm:$0xff]  ;;  %v802_v3 = vld [vmem:[%s3321_s14 + $0x20] sm:$0xff]  ;;  %v821_v4 = vld [vmem:[%s3321_s14 + $0xb8] sm:$0xff] }
  0x18   :  { %2024 = vmatprep.subr.bf16.mxu0 %v2481_v17  ;;  %v820_v5 = vld [vmem:[%s3321_s14 + $0xb0] sm:$0xff]  ;;  %v2511_v7 = vld [vmem:[%s3320_s13 + $0x44] ss:$8 sps:$4 sm:$0xff]   ;;  %v805_v8 = vld [vmem:[%s3321_s14 + $0x38] sm:$0xff] }
  0x19   :  { %381 = vperm.xlu1 %2474, %v359_v14   ;;  %376 = vperm.xlu0 %2473, %v358_v15   ;;  %v804_v9 = vld [vmem:[%s3321_s14 + $0x30] sm:$0xff]  ;;  %v823_v10 = vld [vmem:[%s3321_s14 + $0xc8] sm:$0xff]  ;;  %v822_v11 = vld [vmem:[%s3321_s14 + $0xc0] sm:$0xff] }
  0x1a   :  { %2208 = vmatmul.mubr.msk.bf16.vlgmr.msra.gmra.mrb[0].mxu0 %vm166_vm0, %v2480_v16  ;;  %v2513_v12 = vld [vmem:[%s3320_s13 + $0x40] ss:$8 sps:$4 sm:$0xff]   ;;  %v2514_v13 = vld [vmem:[%s3320_s13 + $0x54] ss:$8 sps:$4 sm:$0xff]  }
  0x1b   :  { %2025 = vmatpush3.bf16.msra.mxu0 %v2482_v18  ;;  %2211 = vmatprep.mubr.msk.bf16.mxu0 %vm166_vm0, %v2485_v19  ;;  %v807_v14 = vld [vmem:[%s3321_s14 + $0x48] sm:$0xff]  ;;  %v806_v15 = vld [vmem:[%s3321_s14 + $0x40] sm:$0xff]  ;;  %v825_v16 = vld [vmem:[%s3321_s14 + $0xd8] sm:$0xff] }
  0x1c   :  { %2026 = vmatprep.subr.bf16.mxu0 %v2483_v22  ;;  %v824_v17 = vld [vmem:[%s3321_s14 + $0xd0] sm:$0xff]  ;;  %v2517_v19 = vld [vmem:[%s3320_s13 + $0x64] ss:$8 sps:$4 sm:$0xff]  }
  0x1d   :  { %391 = vperm.xlu1 %2474, %v361_v20   ;;  %386 = vperm.xlu0 %2473, %v360_v21   ;;  %v2516_v18 = vld [vmem:[%s3320_s13 + $0x50] ss:$8 sps:$4 sm:$0xff]   ;;  %v827_v22 = vld [vmem:[%s3321_s14 + $0xe8] sm:$0xff] }
  0x1e   :  { %v809_v20 = vld [vmem:[%s3321_s14 + $0x58] sm:$0xff]  ;;  %v808_v21 = vld [vmem:[%s3321_s14 + $0x50] sm:$0xff] }
  0x1f   :  { %2027 = vmatpush3.bf16.msra.mxu0 %v2484_v23  ;;  %v826_v23 = vld [vmem:[%s3321_s14 + $0xe0] sm:$0xff] }
  0x20   :  { %2028 = vmatprep.subr.bf16.mxu0 %v2487_v26  ;;  %v811_v26 = vld [vmem:[%s3321_s14 + $0x68] sm:$0xff] }
  0x21   :  { %401 = vperm.xlu1 %2474, %v363_v24   ;;  %396 = vperm.xlu0 %2473, %v362_v25   ;;  %v2519_v24 = vld [vmem:[%s3320_s13 + $0x60] ss:$8 sps:$4 sm:$0xff]   ;;  %v2520_v25 = vld [vmem:[%s3320_s13 + $0x74] ss:$8 sps:$4 sm:$0xff]  }
  0x22   :  { %2212 = vmatmul.mubr.msk.bf16.gmra.mrb[4].mxu0 %vm166_vm0, %v2486_v27  ;;  %v810_v27 = vld [vmem:[%s3321_s14 + $0x60] sm:$0xff] }
  0x23   :  { %2029 = vmatpush3.bf16.msra.mxu0 %v2488_v28  ;;  %1278 = vmatprep.mubr.bf16.mxu0 %v2501_v37  ;;  %v829_v28 = vld [vmem:[%s3321_s14 + $0xf8] sm:$0xff] }
  0x24   :  { %2030 = vmatprep.subr.bf16.mxu0 %v2489_v31  ;;  %v2523_v31 = vld [vmem:[%s3320_s13 + $0x84] ss:$8 sps:$4 sm:$0xff]   ;;  %v2528_v37 = vld [vmem:[%s3320_s13 + $0x90] ss:$8 sps:$4 sm:$0xff]  }
  0x25   :  { %411 = vperm.xlu1 %2474, %v365_v29   ;;  %406 = vperm.xlu0 %2473, %v364_v30   ;;  %v828_v29 = vld [vmem:[%s3321_s14 + $0xf0] sm:$0xff] }
  0x26   :  { %v2522_v30 = vld [vmem:[%s3320_s13 + $0x70] ss:$8 sps:$4 sm:$0xff]  }
  0x27   :  { %2031 = vmatpush3.bf16.msra.mxu0 %v2490_v32  ;;  %v813_v32 = vld [vmem:[%s3321_s14 + $0x78] sm:$0xff] }
  0x28   :  { %2032 = vmatprep.subr.bf16.mxu0 %v2491_v35  ;;  %v2526_v35 = vld [vmem:[%s3320_s13 + $0x94] ss:$8 sps:$4 sm:$0xff]  }
  0x29   :  { %421 = vperm.xlu1 %2474, %v367_v33   ;;  %416 = vperm.xlu0 %2473, %v366_v34   ;;  %v812_v33 = vld [vmem:[%s3321_s14 + $0x70] sm:$0xff]  ;;  %v2525_v34 = vld [vmem:[%s3320_s13 + $0x80] ss:$8 sps:$4 sm:$0xff]  }
  0x2b   :  { %2033 = vmatpush3.bf16.msra.mxu0 %v2492_v36  ;;  %v2564_v36 = vmov 0.0|0.0  }
  0x2c   :  { %2034 = vmatprep.subr.bf16.mxu0 %v2493_v40  ;;  %2361 = vmatprep.subr.bf16.mxu1 %v2564_v36  ;;  %v2566_v40 = vmov 0.0  }
  0x2d   :  { %431 = vperm.xlu1 %2474, %v369_v38   ;;  %426 = vperm.xlu0 %2473, %v368_v39   ;;  %v2529_v38 = vld [vmem:[%s3320_s13 + $0xa4] ss:$8 sps:$4 sm:$0xff]   ;;  %v2531_v39 = vld [vmem:[%s3320_s13 + $0xa0] ss:$8 sps:$4 sm:$0xff]  }
  0x2e   :  { %2231 = vmatprep.mubr.msk.f32.mxu1 %vm2565_vm1, %v2566_v40 }
  0x2f   :  { %2035 = vmatpush3.bf16.msra.mxu0 %v2494_v41  ;;  %v2532_v41 = vld [vmem:[%s3320_s13 + $0xb4] ss:$8 sps:$4 sm:$0xff]  }
  0x30   :  { %2036 = vmatprep.subr.bf16.mxu0 %v2495_v44  ;;  %v2537_v44 = vld [vmem:[%s3320_s13 + $0xc0] ss:$8 sps:$4 sm:$0xff]  }
  0x31   :  { %441 = vperm.xlu1 %2474, %v371_v42   ;;  %436 = vperm.xlu0 %2473, %v370_v43   ;;  %v2534_v42 = vld [vmem:[%s3320_s13 + $0xb0] ss:$8 sps:$4 sm:$0xff]   ;;  %v2535_v43 = vld [vmem:[%s3320_s13 + $0xc4] ss:$8 sps:$4 sm:$0xff]  }
  0x33   :  { %2037 = vmatpush3.bf16.msra.mxu0 %v2496_v45  ;;  %v2538_v45 = vld [vmem:[%s3320_s13 + $0xd4] ss:$8 sps:$4 sm:$0xff]  }
  0x34   :  { %2038 = vmatprep.subr.bf16.mxu0 %v2497_v48  ;;  %v2543_v48 = vld [vmem:[%s3320_s13 + $0xe0] ss:$8 sps:$4 sm:$0xff]  }
  0x35   :  { %451 = vperm.xlu1 %2474, %v373_v46   ;;  %446 = vperm.xlu0 %2473, %v372_v47   ;;  %v2540_v46 = vld [vmem:[%s3320_s13 + $0xd0] ss:$8 sps:$4 sm:$0xff]   ;;  %v2541_v47 = vld [vmem:[%s3320_s13 + $0xe4] ss:$8 sps:$4 sm:$0xff]  }
  0x37   :  { %2039 = vmatpush3.bf16.msra.mxu0 %v2498_v49  ;;  %v2544_v49 = vld [vmem:[%s3320_s13 + $0xf4] ss:$8 sps:$4 sm:$0xff]  }
  0x39   :  { %917 = vperm.xlu1 %2474, %v815_v50   ;;  %912 = vperm.xlu0 %2473, %v814_v51  }
  0x3a   :  { %1279 = vmatmul.mubr.bf16.vlgmr.msra.gmra.mrb[8].mxu0 %v2499_v52 }
  0x3b   :  { %1286 = vmatprep.mubr.bf16.mxu0 %v2502_v53 }
  0x3d   :  { %837 = vperm.xlu1 %2474, %v799_v54   ;;  %832 = vperm.xlu0 %2473, %v798_v55   ;;  %v2546_v54 = vld [vmem:[%s3320_s13 + $0xf0] ss:$8 sps:$4 sm:$0xff]  }
  0x41   :  { %927 = vperm.xlu1 %2474, %v817_v56   ;;  %922 = vperm.xlu0 %2473, %v816_v57  }
  0x42   :  { %1287 = vmatmul.mubr.bf16.gmra.mrb[12].mxu0 %v2504_v58 }
  0x43   :  { %1294 = vmatprep.mubr.bf16.mxu0 %v2505_v59 }
  0x45   :  { %847 = vperm.xlu1 %2474, %v801_v60   ;;  %842 = vperm.xlu0 %2473, %v800_v61  }
  0x49   :  { %937 = vperm.xlu1 %2474, %v819_v62   ;;  %932 = vperm.xlu0 %2473, %v818_v63  }
  0x4a   :  { %1295 = vmatmul.mubr.bf16.gmra.mrb[16].mxu0 %v2507_v0 }
  0x4b   :  { %1302 = vmatprep.mubr.bf16.mxu0 %v2508_v1 }
  0x4d   :  { %857 = vperm.xlu1 %2474, %v803_v2   ;;  %852 = vperm.xlu0 %2473, %v802_v3  }
  0x51   :  { %947 = vperm.xlu1 %2474, %v821_v4   ;;  %942 = vperm.xlu0 %2473, %v820_v5  }
  0x52   :  { %1303 = vmatmul.mubr.bf16.gmra.mrb[20].mxu0 %v2510_v6 }
  0x53   :  { %1310 = vmatprep.mubr.bf16.mxu0 %v2511_v7 }
  0x55   :  { %867 = vperm.xlu1 %2474, %v805_v8   ;;  %862 = vperm.xlu0 %2473, %v804_v9  }
  0x59   :  { %957 = vperm.xlu1 %2474, %v823_v10   ;;  %952 = vperm.xlu0 %2473, %v822_v11  }
  0x5a   :  { %1311 = vmatmul.mubr.bf16.gmra.mrb[24].mxu0 %v2513_v12 }
  0x5b   :  { %1318 = vmatprep.mubr.bf16.mxu0 %v2514_v13 }
  0x5d   :  { %877 = vperm.xlu1 %2474, %v807_v14   ;;  %872 = vperm.xlu0 %2473, %v806_v15  }
  0x61   :  { %967 = vperm.xlu1 %2474, %v825_v16   ;;  %962 = vperm.xlu0 %2473, %v824_v17  }
  0x62   :  { %1319 = vmatmul.mubr.bf16.gmra.mrb[28].mxu0 %v2516_v18 }
  0x63   :  { %1326 = vmatprep.mubr.bf16.mxu0 %v2517_v19 }
  0x65   :  { %887 = vperm.xlu1 %2474, %v809_v20   ;;  %882 = vperm.xlu0 %2473, %v808_v21  }
  0x69   :  { %977 = vperm.xlu1 %2474, %v827_v22   ;;  %972 = vperm.xlu0 %2473, %v826_v23  }
  0x6a   :  { %1327 = vmatmul.mubr.bf16.gmra.mrb[32].mxu0 %v2519_v24 }
  0x6b   :  { %1334 = vmatprep.mubr.bf16.mxu0 %v2520_v25 }
  0x6d   :  { %897 = vperm.xlu1 %2474, %v811_v26   ;;  %892 = vperm.xlu0 %2473, %v810_v27  }
  0x71   :  { %987 = vperm.xlu1 %2474, %v829_v28   ;;  %982 = vperm.xlu0 %2473, %v828_v29  }
  0x72   :  { %1335 = vmatmul.mubr.bf16.gmra.mrb[36].mxu0 %v2522_v30 }
  0x73   :  { %1342 = vmatprep.mubr.bf16.mxu0 %v2523_v31 }
  0x75   :  { %907 = vperm.xlu1 %2474, %v813_v32   ;;  %902 = vperm.xlu0 %2473, %v812_v33  }
  0x7a   :  { %1343 = vmatmul.mubr.bf16.gmra.mrb[40].mxu0 %v2525_v34 }
  0x7b   :  { %1350 = vmatprep.mubr.bf16.mxu0 %v2526_v35 }
  0x82   :  { %1351 = vmatmul.mubr.bf16.gmra.mrb[44].mxu0 %v2528_v37 }
  0x83   :  { %1358 = vmatprep.mubr.bf16.mxu0 %v2529_v38 }
  0x88   :  { %v85_v50 = vpop.permute.xlu0 %84  ;;  %v95_v51 = vpop.permute.xlu1 %94 }
  0x8a   :  { %1359 = vmatmul.mubr.bf16.gmra.mrb[48].mxu0 %v2531_v39 }
  0x8b   :  { %1366 = vmatprep.mubr.bf16.mxu0 %v2532_v41 }
  0x8c   :  { %v90_v52 = vpop.permute.xlu0 %89  ;;  %v100_v53 = vpop.permute.xlu1 %99 }
  0x90   :  { %v105_v55 = vpop.permute.xlu0 %104  ;;  %v110_v56 = vpop.permute.xlu1 %109 }
  0x92   :  { %1367 = vmatmul.mubr.bf16.gmra.mrb[52].mxu0 %v2534_v42 }
  0x93   :  { %1374 = vmatprep.mubr.bf16.mxu0 %v2535_v43 }
  0x94   :  { %v115_v57 = vpop.permute.xlu0 %114  ;;  %v120_v58 = vpop.permute.xlu1 %119 }
  0x98   :  { %v3004_v59 = vpop.permute.xlu0 %376  ;;  %v3006_v60 = vpop.permute.xlu1 %381 }
  0x9a   :  { %1375 = vmatmul.mubr.bf16.gmra.mrb[56].mxu0 %v2537_v44 }
  0x9b   :  { %1382 = vmatprep.mubr.bf16.mxu0 %v2538_v45 }
  0x9c   :  { %v3008_v61 = vpop.permute.xlu0 %386  ;;  %v3010_v62 = vpop.permute.xlu1 %391 }
  0xa0   :  { %v3012_v63 = vpop.permute.xlu0 %396  ;;  %v3014_v0 = vpop.permute.xlu1 %401 }
  0xa2   :  { %1383 = vmatmul.mubr.bf16.gmra.mrb[60].mxu0 %v2540_v46 }
  0xa3   :  { %1390 = vmatprep.mubr.bf16.mxu0 %v2541_v47 }
  0xa4   :  { %v3016_v1 = vpop.permute.xlu0 %406  ;;  %v3018_v2 = vpop.permute.xlu1 %411 }
  0xa8   :  { %v3020_v3 = vpop.permute.xlu0 %416  ;;  %v3022_v4 = vpop.permute.xlu1 %421 }
  0xaa   :  { %1391 = vmatmul.mubr.bf16.gmra.mrb[64].mxu0 %v2543_v48  ;;  %v2547_v48 = vld [vmem:[%s3322_s6] sm:$0xff]  }
  0xab   :  { %1398 = vmatprep.mubr.bf16.mxu0 %v2544_v49 }
  0xac   :  { %v3024_v5 = vpop.permute.xlu0 %426  ;;  %v3026_v6 = vpop.permute.xlu1 %431 }
  0xb0   :  { %v3028_v7 = vpop.permute.xlu0 %436  ;;  %v3030_v8 = vpop.permute.xlu1 %441 }
  0xb2   :  { %1399 = vmatmul.mubr.bf16.gmra.mrb[68].mxu0 %v2546_v54 }
  0xb4   :  { %v3032_v9 = vpop.permute.xlu0 %446  ;;  %v3034_v10 = vpop.permute.xlu1 %451 }
  0xb8   :  { %v3036_v12 = vpop.permute.xlu0 %912  ;;  %v3038_v15 = vpop.permute.xlu1 %917 }
  0xbc   :  { %v833_v23 = vpop.permute.xlu0 %832  ;;  %v838_v28 = vpop.permute.xlu1 %837 }
  0xc0   :  { %v3041_v38 = vpop.permute.xlu0 %922  ;;  %v3043_v44 = vpop.permute.xlu1 %927 }
  0xc4   :  { %v843_v47 = vpop.permute.xlu0 %842  ;;  %v848_v49 = vpop.permute.xlu1 %847 }
  0xc8   :  { %v3062_v54 = vpop.permute.xlu1 %937 }
  0xed   :  { %v2209_v11 = vpop.f32.mrb[0].mxu0 }
  0xee   :  { %v213_v13 = vpop.f32.mrb[1].mxu0  ;;  %v222_v14 = vadd.f32 %v2209_v11, %v95_v51  ;;  %v2555_v51 = vld [vmem:[%s3323_s7] sm:$0xff]   ;;  %v858_v11 = vpop.permute.xlu1 %857 }
  0xef   :  { %v214_v16 = vadd.f32 %v213_v13, %v85_v50  ;;  %v2210_v17 = vpop.f32.mrb[2].mxu0  ;;  %v252_v50 = vld [vmem:[%s3324_s3] sm:$0xff] }
  0xf0   :  { %v225_v18 = vadd.f32 %v2210_v17, %v100_v53  ;;  %v216_v19 = vpop.f32.mrb[3].mxu0  ;;  %v246_v21 = vmax.f32 %v222_v14, 0.0  ;;  %v3059_v53 = vpop.permute.xlu0 %932 }
  0xf1   :  { %v217_v20 = vadd.f32 %v216_v19, %v90_v52  ;;  %v244_v24 = vmax.f32 %v214_v16, 0.0  ;;  %v2548_v52 = vld [vmem:[%s3322_s6 + $0x8] sm:$0xff]  }
  0xf2   :  { %v247_v22 = vmax.f32 %v225_v18, 0.0 }
  0xf3   :  { %v245_v25 = vmax.f32 %v217_v20, 0.0  ;;  %v2551_v20 = vld [vmem:[%s3322_s6 + $0x20] sm:$0xff]  }
  0xf4   :  { %v2365_v26 = vpack.c.bf16 %v247_v22, %v246_v21 }
  0xf5   :  { %v2213_v27 = vpop.f32.mrb[4].mxu0  ;;  %v2362_v31 = vpack.c.bf16 %v245_v25, %v244_v24  ;;  %v3075_v24 = vpop.permute.xlu1 %947 }
  0xf6   :  { %v238_v29 = vadd.f32 %v2213_v27, %v115_v57  ;;  %v229_v30 = vpop.f32.mrb[5].mxu0 }
  0xf7   :  { %v230_v32 = vadd.f32 %v229_v30, %v105_v55  ;;  %v2214_v33 = vpop.f32.mrb[6].mxu0  ;;  %2363 = vmatpush3.bf16.msra.mxu1 %v2362_v31  ;;  %v2549_v55 = vld [vmem:[%s3322_s6 + $0x10] sm:$0xff]  }
  0xf8   :  { %v241_v34 = vadd.f32 %v2214_v33, %v120_v58  ;;  %v232_v35 = vpop.f32.mrb[7].mxu0  ;;  %2364 = vmatprep.subr.bf16.mxu1 %v2564_v36  ;;  %v250_v39 = vmax.f32 %v238_v29, 0.0  ;;  %v2550_v58 = vld [vmem:[%s3322_s6 + $0x18] sm:$0xff]  }
  0xf9   :  { %v233_v37 = vadd.f32 %v232_v35, %v110_v56  ;;  %v248_v42 = vmax.f32 %v230_v32, 0.0  ;;  %v853_v56 = vpop.permute.xlu0 %852 }
  0xfa   :  { %v251_v41 = vmax.f32 %v241_v34, 0.0 }
  0xfb   :  { %v249_v43 = vmax.f32 %v233_v37, 0.0  ;;  %2366 = vmatpush3.bf16.msra.mxu1 %v2365_v26  ;;  %v2553_v37 = vld [vmem:[%s3322_s6 + $0x30] sm:$0xff]  }
  0xfc   :  { %v2371_v45 = vpack.c.bf16 %v251_v41, %v250_v39  ;;  %2367 = vmatprep.subr.bf16.mxu1 %v2564_v36  ;;  %v868_v39 = vpop.permute.xlu1 %867 }
  0xfd   :  { %v2368_v46 = vpack.c.bf16 %v249_v43, %v248_v42  ;;  %v3073_v21 = vpop.permute.xlu0 %942 }
  0xff   :  { %2369 = vmatpush3.bf16.msra.mxu1 %v2368_v46  ;;  %v2554_v46 = vld [vmem:[%s3322_s6 + $0x38] sm:$0xff]  }
 0x100   :  { %2370 = vmatprep.subr.bf16.mxu1 %v2564_v36 }
 0x101   :  { %v863_v33 = vpop.permute.xlu0 %862 }
 0x103   :  { %2372 = vmatpush3.bf16.msra.mxu1 %v2371_v45 }
 0x104   :  { %2234 = vmatprep.subr.bf16.mxu1 %v2547_v48 }
 0x106   :  { %2232 = vmatmul.mubr.msk.f32.vlgmr.msra.gmra.mrb[0].mxu1 %vm166_vm0, %v252_v50 }
 0x107   :  { %2235 = vmatpush3.bf16.msra.mxu1 %v2547_v48  ;;  %2250 = vmatprep.mubr.bf16.mxu1 %v2555_v51  ;;  %v3088_v48 = vpop.permute.xlu0 %952 }
 0x108   :  { %2236 = vmatprep.subr.bf16.mxu1 %v2548_v52 }
 0x10b   :  { %2237 = vmatpush3.bf16.msra.mxu1 %v2548_v52 }
 0x10c   :  { %2238 = vmatprep.subr.bf16.mxu1 %v2549_v55 }
 0x10d   :  { %v2040_v57 = vpop.f32.mrb[8].mxu0 }
 0x10e   :  { %v2041_v13 = vpop.f32.mrb[9].mxu0 }
 0x10f   :  { %v2042_v14 = vadd.f32 %v2041_v13, %v2040_v57  ;;  %v2043_v16 = vpop.f32.mrb[10].mxu0  ;;  %2239 = vmatpush3.bf16.msra.mxu1 %v2549_v55  ;;  %v3092_v55 = vpop.permute.xlu1 %957 }
 0x110   :  { %v2044_v17 = vpop.f32.mrb[11].mxu0  ;;  %2240 = vmatprep.subr.bf16.mxu1 %v2550_v58 }
 0x111   :  { %v1281_v18 = vadd.f32 %v2042_v14, %v833_v23  ;;  %v2045_v19 = vadd.f32 %v2044_v17, %v2043_v16  ;;  %v2552_v23 = vld [vmem:[%s3322_s6 + $0x28] sm:$0xff]   ;;  %v873_v16 = vpop.permute.xlu0 %872  ;;  %v2557_v17 = vld [vmem:[%s3323_s7 + $0x10] sm:$0xff]  }
 0x112   :  { %v2556_v14 = vld [vmem:[%s3323_s7 + $0x8] sm:$0xff]  }
 0x113   :  { %v1284_v22 = vadd.f32 %v2045_v19, %v838_v28  ;;  %2241 = vmatpush3.bf16.msra.mxu1 %v2550_v58  ;;  %v1407_v25 = vmax.f32 %v1281_v18, 0.0 }
 0x114   :  { %2242 = vmatprep.subr.bf16.mxu1 %v2551_v20 }
 0x115   :  { %v1408_v26 = vmax.f32 %v1284_v22, 0.0  ;;  %v2046_v27 = vpop.f32.mrb[12].mxu0  ;;  %v878_v22 = vpop.permute.xlu1 %877 }
 0x116   :  { %v2047_v29 = vpop.f32.mrb[13].mxu0 }
 0x117   :  { %v3080_v30 = vpack.c.bf16 %v1408_v26, %v1407_v25  ;;  %v2048_v31 = vadd.f32 %v2047_v29, %v2046_v27  ;;  %v2049_v32 = vpop.f32.mrb[14].mxu0  ;;  %2243 = vmatpush3.bf16.msra.mxu1 %v2551_v20 }
 0x118   :  { %v2050_v34 = vpop.f32.mrb[15].mxu0  ;;  %2244 = vmatprep.subr.bf16.mxu1 %v2552_v23 }
 0x119   :  { %v1289_v28 = vadd.f32 %v2048_v31, %v843_v47  ;;  %v2051_v35 = vadd.f32 %v2050_v34, %v2049_v32  ;;  %v3103_v31 = vpop.permute.xlu0 %962  ;;  %v2558_v34 = vld [vmem:[%s3323_s7 + $0x18] sm:$0xff]  }
 0x11b   :  { %v1292_v41 = vadd.f32 %v2051_v35, %v848_v49  ;;  %2245 = vmatpush3.bf16.msra.mxu1 %v2552_v23  ;;  %v1409_v42 = vmax.f32 %v1289_v28, 0.0  ;;  %v3108_v28 = vpop.permute.xlu1 %967  ;;  %v2559_v35 = vld [vmem:[%s3323_s7 + $0x20] sm:$0xff]  }
 0x11c   :  { %2246 = vmatprep.subr.bf16.mxu1 %v2553_v37 }
 0x11d   :  { %v1410_v43 = vmax.f32 %v1292_v41, 0.0  ;;  %v2052_v45 = vpop.f32.mrb[16].mxu0 }
 0x11e   :  { %v2053_v47 = vpop.f32.mrb[17].mxu0 }
 0x11f   :  { %v3090_v50 = vpack.c.bf16 %v1410_v43, %v1409_v42  ;;  %v2054_v51 = vadd.f32 %v2053_v47, %v2052_v45  ;;  %v2055_v52 = vpop.f32.mrb[18].mxu0  ;;  %2247 = vmatpush3.bf16.msra.mxu1 %v2553_v37 }
 0x120   :  { %v2056_v49 = vpop.f32.mrb[19].mxu0  ;;  %2248 = vmatprep.subr.bf16.mxu1 %v2554_v46 }
 0x121   :  { %v1297_v57 = vadd.f32 %v2054_v51, %v853_v56  ;;  %v2057_v58 = vadd.f32 %v2056_v49, %v2055_v52  ;;  %v888_v49 = vpop.permute.xlu1 %887 }
 0x123   :  { %v1300_v13 = vadd.f32 %v2057_v58, %v858_v11  ;;  %2249 = vmatpush3.bf16.msra.mxu1 %v2554_v46  ;;  %v1411_v18 = vmax.f32 %v1297_v57, 0.0  ;;  %v2560_v58 = vld [vmem:[%s3323_s7 + $0x28] sm:$0xff]  }
 0x124   :  { %2373 = vmatprep.subr.bf16.mxu1 %v2564_v36 }
 0x125   :  { %v1412_v19 = vmax.f32 %v1300_v13, 0.0  ;;  %v2058_v20 = vpop.f32.mrb[20].mxu0  ;;  %v2561_v13 = vld [vmem:[%s3323_s7 + $0x30] sm:$0xff]  }
 0x126   :  { %v2059_v56 = vpop.f32.mrb[21].mxu0  ;;  %2251 = vmatmul.mubr.bf16.vlgmr.msra.gmra.mrb[4].mxu1 %v2556_v14 }
 0x127   :  { %v3101_v25 = vpack.c.bf16 %v1412_v19, %v1411_v18  ;;  %v2060_v11 = vadd.f32 %v2059_v56, %v2058_v20  ;;  %v2061_v26 = vpop.f32.mrb[22].mxu0  ;;  %2254 = vmatprep.mubr.bf16.mxu1 %v2557_v17 }
 0x128   :  { %v2062_v27 = vpop.f32.mrb[23].mxu0 }
 0x129   :  { %v1305_v23 = vadd.f32 %v2060_v11, %v863_v33  ;;  %v2063_v29 = vadd.f32 %v2062_v27, %v2061_v26 }
 0x12b   :  { %v1308_v32 = vadd.f32 %v2063_v29, %v868_v39  ;;  %v1413_v37 = vmax.f32 %v1305_v23, 0.0  ;;  %v883_v39 = vpop.permute.xlu0 %882 }
 0x12d   :  { %v1414_v41 = vmax.f32 %v1308_v32, 0.0  ;;  %v2064_v42 = vpop.f32.mrb[24].mxu0  ;;  %v2562_v32 = vld [vmem:[%s3323_s7 + $0x38] sm:$0xff]   ;;  %s2567_s7 = smov 64  }
 0x12e   :  { %v2065_v43 = vpop.f32.mrb[25].mxu0  ;;  %2255 = vmatmul.mubr.bf16.gmra.mrb[8].mxu1 %v2558_v34 }
 0x12f   :  { %v3113_v45 = vpack.c.bf16 %v1414_v41, %v1413_v37  ;;  %v2066_v33 = vadd.f32 %v2065_v43, %v2064_v42  ;;  %v2067_v46 = vpop.f32.mrb[26].mxu0  ;;  %2258 = vmatprep.mubr.bf16.mxu1 %v2559_v35  ;;  %v3121_v19 = vpop.permute.xlu0 %972 }
 0x130   :  { %v2068_v47 = vpop.f32.mrb[27].mxu0 }
 0x131   :  { %v1313_v51 = vadd.f32 %v2066_v33, %v873_v16  ;;  %v2069_v52 = vadd.f32 %v2068_v47, %v2067_v46 }
 0x133   :  { %v1316_v57 = vadd.f32 %v2069_v52, %v878_v22  ;;  %v1415_v14 = vmax.f32 %v1313_v51, 0.0  ;;  %v3125_v22 = vpop.permute.xlu1 %977  ;;  %v893_v34 = vpop.permute.xlu0 %892 }
 0x135   :  { %v1416_v17 = vmax.f32 %v1316_v57, 0.0  ;;  %v2070_v18 = vpop.f32.mrb[28].mxu0 }
 0x136   :  { %v2071_v20 = vpop.f32.mrb[29].mxu0  ;;  %2259 = vmatmul.mubr.bf16.gmra.mrb[12].mxu1 %v2560_v58 }
 0x137   :  { %v3123_v56 = vpack.c.bf16 %v1416_v17, %v1415_v14  ;;  %v2072_v16 = vadd.f32 %v2071_v20, %v2070_v18  ;;  %v2073_v11 = vpop.f32.mrb[30].mxu0  ;;  %2262 = vmatprep.mubr.bf16.mxu1 %v2561_v13  ;;  %v898_v42 = vpop.permute.xlu1 %897 }
 0x138   :  { %v2074_v26 = vpop.f32.mrb[31].mxu0 }
 0x139   :  { %v1321_v27 = vadd.f32 %v2072_v16, %v883_v39  ;;  %v2075_v23 = vadd.f32 %v2074_v26, %v2073_v11 }
 0x13b   :  { %v1324_v29 = vadd.f32 %v2075_v23, %v888_v49  ;;  %v1417_v35 = vmax.f32 %v1321_v27, 0.0  ;;  %v3134_v49 = vpop.permute.xlu0 %982  ;;  %v3136_v58 = vpop.permute.xlu1 %987 }
 0x13d   :  { %v1418_v37 = vmax.f32 %v1324_v29, 0.0  ;;  %v2076_v41 = vpop.f32.mrb[32].mxu0 }
 0x13e   :  { %v2077_v43 = vpop.f32.mrb[33].mxu0  ;;  %2263 = vmatmul.mubr.bf16.gmra.mrb[16].mxu1 %v2562_v32 }
 0x13f   :  { %v3130_v33 = vpack.c.bf16 %v1418_v37, %v1417_v35  ;;  %v2078_v46 = vadd.f32 %v2077_v43, %v2076_v41  ;;  %v2079_v47 = vpop.f32.mrb[34].mxu0  ;;  %2298 = vmatprep.mubr.msk.f32.mxu1 %vm2565_vm1, %v2566_v40  ;;  %v903_v26 = vpop.permute.xlu0 %902 }
 0x140   :  { %v2080_v51 = vpop.f32.mrb[35].mxu0  ;;  %v908_v32 = vpop.permute.xlu1 %907 }
 0x141   :  { %v1329_v39 = vadd.f32 %v2078_v46, %v893_v34  ;;  %v2081_v52 = vadd.f32 %v2080_v51, %v2079_v47 }
 0x143   :  { %v1332_v57 = vadd.f32 %v2081_v52, %v898_v42  ;;  %v1419_v13 = vmax.f32 %v1329_v39, 0.0 }
 0x145   :  { %v1420_v14 = vmax.f32 %v1332_v57, 0.0  ;;  %v2082_v17 = vpop.f32.mrb[36].mxu0 }
 0x146   :  { %v2083_v18 = vpop.f32.mrb[37].mxu0 }
 0x147   :  { %v3138_v20 = vpack.c.bf16 %v1420_v14, %v1419_v13  ;;  %v2084_v16 = vadd.f32 %v2083_v18, %v2082_v17  ;;  %v2085_v11 = vpop.f32.mrb[38].mxu0 }
 0x148   :  { %v2086_v27 = vpop.f32.mrb[39].mxu0 }
 0x149   :  { %v1337_v23 = vadd.f32 %v2084_v16, %v903_v26  ;;  %v2087_v29 = vadd.f32 %v2086_v27, %v2085_v11 }
 0x14b   :  { %v1340_v34 = vadd.f32 %v2087_v29, %v908_v32  ;;  %v1421_v35 = vmax.f32 %v1337_v23, 0.0 }
 0x14d   :  { %v1422_v37 = vmax.f32 %v1340_v34, 0.0  ;;  %v2088_v41 = vpop.f32.mrb[40].mxu0 }
 0x14e   :  { %v2089_v42 = vpop.f32.mrb[41].mxu0 }
 0x14f   :  { %v3140_v43 = vpack.c.bf16 %v1422_v37, %v1421_v35  ;;  %v2090_v46 = vadd.f32 %v2089_v42, %v2088_v41  ;;  %v2091_v47 = vpop.f32.mrb[42].mxu0 }
 0x150   :  { %v2092_v51 = vpop.f32.mrb[43].mxu0 }
 0x151   :  { %v1345_v39 = vadd.f32 %v2090_v46, %v3036_v12  ;;  %v2093_v52 = vadd.f32 %v2092_v51, %v2091_v47 }
 0x153   :  { %v1348_v57 = vadd.f32 %v2093_v52, %v3038_v15  ;;  %v1423_v13 = vmax.f32 %v1345_v39, 0.0 }
 0x155   :  { %v1424_v14 = vmax.f32 %v1348_v57, 0.0  ;;  %v2094_v17 = vpop.f32.mrb[44].mxu0 }
 0x156   :  { %v2095_v18 = vpop.f32.mrb[45].mxu0 }
 0x157   :  { %v2096_v16 = vadd.f32 %v2095_v18, %v2094_v17  ;;  %v2097_v11 = vpop.f32.mrb[46].mxu0  ;;  %v3144_v26 = vpack.c.bf16 %v1424_v14, %v1423_v13 }
 0x158   :  { %v2098_v27 = vpop.f32.mrb[47].mxu0 }
 0x159   :  { %v1353_v23 = vadd.f32 %v2096_v16, %v3041_v38  ;;  %v2099_v29 = vadd.f32 %v2098_v27, %v2097_v11 }
 0x15b   :  { %v1356_v32 = vadd.f32 %v2099_v29, %v3043_v44  ;;  %v1425_v34 = vmax.f32 %v1353_v23, 0.0 }
 0x15d   :  { %v1426_v35 = vmax.f32 %v1356_v32, 0.0  ;;  %v2100_v12 = vpop.f32.mrb[48].mxu0 }
 0x15e   :  { %v2101_v37 = vpop.f32.mrb[49].mxu0 }
 0x15f   :  { %v2102_v41 = vadd.f32 %v2101_v37, %v2100_v12  ;;  %v2103_v15 = vpop.f32.mrb[50].mxu0  ;;  %v3148_v42 = vpack.c.bf16 %v1426_v35, %v1425_v34 }
 0x160   :  { %v2104_v46 = vpop.f32.mrb[51].mxu0 }
 0x161   :  { %v1361_v47 = vadd.f32 %v2102_v41, %v3059_v53  ;;  %v2105_v51 = vadd.f32 %v2104_v46, %v2103_v15 }
 0x163   :  { %v1364_v39 = vadd.f32 %v2105_v51, %v3062_v54  ;;  %v1427_v52 = vmax.f32 %v1361_v47, 0.0 }
 0x165   :  { %v1428_v57 = vmax.f32 %v1364_v39, 0.0  ;;  %v2106_v38 = vpop.f32.mrb[52].mxu0 }
 0x166   :  { %v2107_v13 = vpop.f32.mrb[53].mxu0 }
 0x167   :  { %v2108_v14 = vadd.f32 %v2107_v13, %v2106_v38  ;;  %v2109_v44 = vpop.f32.mrb[54].mxu0  ;;  %v3152_v17 = vpack.c.bf16 %v1428_v57, %v1427_v52 }
 0x168   :  { %v2110_v18 = vpop.f32.mrb[55].mxu0 }
 0x169   :  { %v1369_v16 = vadd.f32 %v2108_v14, %v3073_v21  ;;  %v2111_v11 = vadd.f32 %v2110_v18, %v2109_v44 }
 0x16b   :  { %v1372_v27 = vadd.f32 %v2111_v11, %v3075_v24  ;;  %v1429_v23 = vmax.f32 %v1369_v16, 0.0 }
 0x16d   :  { %v1430_v29 = vmax.f32 %v1372_v27, 0.0  ;;  %v2112_v53 = vpop.f32.mrb[56].mxu0 }
 0x16e   :  { %v2113_v32 = vpop.f32.mrb[57].mxu0 }
 0x16f   :  { %v2114_v34 = vadd.f32 %v2113_v32, %v2112_v53  ;;  %v2115_v54 = vpop.f32.mrb[58].mxu0  ;;  %v3156_v35 = vpack.c.bf16 %v1430_v29, %v1429_v23 }
 0x170   :  { %v2116_v12 = vpop.f32.mrb[59].mxu0 }
 0x171   :  { %v1377_v37 = vadd.f32 %v2114_v34, %v3088_v48  ;;  %v2117_v41 = vadd.f32 %v2116_v12, %v2115_v54 }
 0x173   :  { %v1380_v15 = vadd.f32 %v2117_v41, %v3092_v55  ;;  %v1431_v46 = vmax.f32 %v1377_v37, 0.0 }
 0x175   :  { %v1432_v47 = vmax.f32 %v1380_v15, 0.0  ;;  %v2118_v21 = vpop.f32.mrb[60].mxu0 }
 0x176   :  { %v2119_v51 = vpop.f32.mrb[61].mxu0 }
 0x177   :  { %v2120_v39 = vadd.f32 %v2119_v51, %v2118_v21  ;;  %v2121_v24 = vpop.f32.mrb[62].mxu0  ;;  %v3160_v52 = vpack.c.bf16 %v1432_v47, %v1431_v46 }
 0x178   :  { %v2122_v57 = vpop.f32.mrb[63].mxu0 }
 0x179   :  { %v1385_v38 = vadd.f32 %v2120_v39, %v3103_v31  ;;  %v2123_v13 = vadd.f32 %v2122_v57, %v2121_v24 }
 0x17b   :  { %v1388_v14 = vadd.f32 %v2123_v13, %v3108_v28  ;;  %v1433_v44 = vmax.f32 %v1385_v38, 0.0 }
 0x17d   :  { %v1434_v18 = vmax.f32 %v1388_v14, 0.0  ;;  %v2124_v48 = vpop.f32.mrb[64].mxu0 }
 0x17e   :  { %v2125_v16 = vpop.f32.mrb[65].mxu0 }
 0x17f   :  { %v2126_v11 = vadd.f32 %v2125_v16, %v2124_v48  ;;  %v2127_v55 = vpop.f32.mrb[66].mxu0  ;;  %v3164_v27 = vpack.c.bf16 %v1434_v18, %v1433_v44 }
 0x180   :  { %v2128_v23 = vpop.f32.mrb[67].mxu0 }
 0x181   :  { %v1393_v29 = vadd.f32 %v2126_v11, %v3121_v19  ;;  %v2129_v53 = vadd.f32 %v2128_v23, %v2127_v55 }
 0x183   :  { %v1396_v32 = vadd.f32 %v2129_v53, %v3125_v22  ;;  %v1435_v34 = vmax.f32 %v1393_v29, 0.0 }
 0x185   :  { %v1436_v54 = vmax.f32 %v1396_v32, 0.0  ;;  %v2130_v31 = vpop.f32.mrb[68].mxu0 }
 0x186   :  { %v2131_v12 = vpop.f32.mrb[69].mxu0 }
 0x187   :  { %v2132_v37 = vadd.f32 %v2131_v12, %v2130_v31  ;;  %v2133_v28 = vpop.f32.mrb[70].mxu0  ;;  %v3168_v41 = vpack.c.bf16 %v1436_v54, %v1435_v34 }
 0x188   :  { %v2134_v15 = vpop.f32.mrb[71].mxu0 }
 0x189   :  { %v1401_v46 = vadd.f32 %v2132_v37, %v3134_v49  ;;  %v2135_v47 = vadd.f32 %v2134_v15, %v2133_v28 }
 0x18b   :  { %v1404_v21 = vadd.f32 %v2135_v47, %v3136_v58  ;;  %v1437_v51 = vmax.f32 %v1401_v46, 0.0 }
 0x18d   :  { %v1438_v39 = vmax.f32 %v1404_v21, 0.0 }
 0x18f   :  { %v3172_v19 = vpack.c.bf16 %v1438_v39, %v1437_v51 }
 0x1d9   :  { %v3174_v24 = vpop.f32.mrb[0].mxu1 }
 0x1da   :  { %v2233_v22 = vpop.f32.mrb[1].mxu1  ;;  %1716 = vrot.lane.b32.xlu0 %v3174_v24, %s2567_s7 }
 0x1f9   :  { %v2252_v57 = vpop.f32.mrb[4].mxu1 }
 0x1fa   :  { %v593_v38 = vadd.f32 %v2252_v57, %v3008_v61  ;;  %v584_v13 = vpop.f32.mrb[5].mxu1 }
 0x1fb   :  { %v585_v14 = vadd.f32 %v584_v13, %v3004_v59  ;;  %v2253_v49 = vpop.f32.mrb[6].mxu1 }
 0x1fc   :  { %v596_v44 = vadd.f32 %v2253_v49, %v3010_v62  ;;  %v587_v58 = vpop.f32.mrb[7].mxu1  ;;  %v649_v48 = vmax.f32 %v593_v38, 0.0 }
 0x1fd   :  { %v588_v18 = vadd.f32 %v587_v58, %v3006_v60  ;;  %v647_v11 = vmax.f32 %v585_v14, 0.0 }
 0x1fe   :  { %v650_v16 = vmax.f32 %v596_v44, 0.0 }
 0x1ff   :  { %v648_v55 = vmax.f32 %v588_v18, 0.0 }
 0x200   :  { %v2377_v23 = vpack.c.bf16 %v650_v16, %v649_v48 }
 0x201   :  { %v2374_v29 = vpack.c.bf16 %v648_v55, %v647_v11  ;;  %v2256_v53 = vpop.f32.mrb[8].mxu1 }
 0x202   :  { %v609_v32 = vadd.f32 %v2256_v53, %v3016_v1  ;;  %v600_v34 = vpop.f32.mrb[9].mxu1  ;;  %v1603_v53 = vld [vmem:[%s3328_s10 + $0x18] sm:$0xff] }
 0x203   :  { %v601_v61 = vadd.f32 %v600_v34, %v3012_v63  ;;  %v2257_v54 = vpop.f32.mrb[10].mxu1  ;;  %2375 = vmatpush3.bf16.msra.mxu1 %v2374_v29 }
 0x204   :  { %v612_v59 = vadd.f32 %v2257_v54, %v3018_v2  ;;  %v603_v62 = vpop.f32.mrb[11].mxu1  ;;  %2376 = vmatprep.subr.bf16.mxu1 %v2564_v36  ;;  %v653_v31 = vmax.f32 %v609_v32, 0.0 }
 0x205   :  { %v604_v60 = vadd.f32 %v603_v62, %v3014_v0  ;;  %v651_v37 = vmax.f32 %v601_v61, 0.0 }
 0x206   :  { %v654_v12 = vmax.f32 %v612_v59, 0.0 }
 0x207   :  { %v652_v28 = vmax.f32 %v604_v60, 0.0  ;;  %2378 = vmatpush3.bf16.msra.mxu1 %v2377_v23  ;;  %v1966_v60 = vld [vmem:[%s3329_s5] ss:$0 sm:$0xff]  ;;  %s2569_s5 = smov 16  }
 0x208   :  { %v2383_v15 = vpack.c.bf16 %v654_v12, %v653_v31  ;;  %2379 = vmatprep.subr.bf16.mxu1 %v2564_v36 }
 0x209   :  { %v2380_v1 = vpack.c.bf16 %v652_v28, %v651_v37  ;;  %v2260_v46 = vpop.f32.mrb[12].mxu1  ;;  %v1693_v28 = vstv %s3332_s16 }
 0x20a   :  { %v625_v63 = vadd.f32 %v2260_v46, %v3024_v5  ;;  %v616_v47 = vpop.f32.mrb[13].mxu1 }
 0x20b   :  { %v617_v2 = vadd.f32 %v616_v47, %v3020_v3  ;;  %v2261_v21 = vpop.f32.mrb[14].mxu1  ;;  %2381 = vmatpush3.bf16.msra.mxu1 %v2380_v1 }
 0x20c   :  { %v628_v51 = vadd.f32 %v2261_v21, %v3026_v6  ;;  %v619_v0 = vpop.f32.mrb[15].mxu1  ;;  %2382 = vmatprep.subr.bf16.mxu1 %v2564_v36  ;;  %v657_v22 = vmax.f32 %v625_v63, 0.0 }
 0x20d   :  { %v620_v39 = vadd.f32 %v619_v0, %v3022_v4  ;;  %v655_v38 = vmax.f32 %v617_v2, 0.0 }
 0x20e   :  { %v658_v57 = vmax.f32 %v628_v51, 0.0 }
 0x20f   :  { %v656_v13 = vmax.f32 %v620_v39, 0.0  ;;  %2384 = vmatpush3.bf16.msra.mxu1 %v2383_v15 }
 0x210   :  { %v2389_v14 = vpack.c.bf16 %v658_v57, %v657_v22  ;;  %2385 = vmatprep.subr.bf16.mxu1 %v2564_v36 }
 0x211   :  { %v2386_v5 = vpack.c.bf16 %v656_v13, %v655_v38  ;;  %v2264_v49 = vpop.f32.mrb[16].mxu1 }
 0x212   :  { %v641_v3 = vadd.f32 %v2264_v49, %v3032_v9  ;;  %v632_v44 = vpop.f32.mrb[17].mxu1 }
 0x213   :  { %v633_v6 = vadd.f32 %v632_v44, %v3028_v7  ;;  %v2265_v58 = vpop.f32.mrb[18].mxu1  ;;  %2387 = vmatpush3.bf16.msra.mxu1 %v2386_v5  ;;  %v663_v7 = vld [vmem:[%s3325_s9] sm:$0xff]  ;;  %s2568_s9 = smov 96  }
 0x214   :  { %v644_v18 = vadd.f32 %v2265_v58, %v3034_v10  ;;  %v635_v4 = vpop.f32.mrb[19].mxu1  ;;  %2388 = vmatprep.subr.bf16.mxu1 %v2564_v36  ;;  %v661_v16 = vmax.f32 %v641_v3, 0.0  ;;  %v1512_v10 = vld [vmem:[%s3327_s4] sm:$0xff] }
 0x215   :  { %v636_v48 = vadd.f32 %v635_v4, %v3030_v8  ;;  %v659_v55 = vmax.f32 %v633_v6, 0.0  ;;  %v1440_v8 = vld [vmem:[%s3326_s15 + $0x8] sm:$0xff] }
 0x216   :  { %v662_v11 = vmax.f32 %v644_v18, 0.0 }
 0x217   :  { %v660_v23 = vmax.f32 %v636_v48, 0.0  ;;  %2390 = vmatpush3.bf16.msra.mxu1 %v2389_v14 }
 0x218   :  { %v2395_v29 = vpack.c.bf16 %v662_v11, %v661_v16  ;;  %2391 = vmatprep.subr.bf16.mxu1 %v2564_v36 }
 0x219   :  { %v2392_v9 = vpack.c.bf16 %v660_v23, %v659_v55 }
 0x21b   :  { %2393 = vmatpush3.bf16.msra.mxu1 %v2392_v9 }
 0x21c   :  { %2394 = vmatprep.subr.bf16.mxu1 %v2564_v36 }
 0x21f   :  { %2396 = vmatpush3.bf16.msra.mxu1 %v2395_v29 }
 0x220   :  { %2398 = vmatprep.subr.bf16.mxu1 %v3144_v26 }
 0x222   :  { %2299 = vmatmul.mubr.f32.vlgmr.msra.gmra.mrb[2].mxu1 %v663_v7 }
 0x223   :  { %2400 = vmatpush3.bf16.msra.mxu1 %v3080_v30  ;;  %1505 = vmatprep.mubr.f32.mxu1 %v1440_v8  ;;  %v1513_v30 = vld [vmem:[%s3327_s4 + $0x8] sm:$0xff] }
 0x224   :  { %2402 = vmatprep.subr.bf16.mxu1 %v3148_v42  ;;  %v1518_v42 = vld [vmem:[%s3327_s4 + $0x30] sm:$0xff] }
 0x227   :  { %2404 = vmatpush3.bf16.msra.mxu1 %v3090_v50  ;;  %v1439_v50 = vld [vmem:[%s3326_s15] sm:$0xff] }
 0x228   :  { %2406 = vmatprep.subr.bf16.mxu1 %v3152_v17  ;;  %v1519_v17 = vld [vmem:[%s3327_s4 + $0x38] sm:$0xff] }
 0x22b   :  { %2408 = vmatpush3.bf16.msra.mxu1 %v3101_v25  ;;  %v2430_v25 = vpack.c.bf16 %v1513_v30, %v1512_v10 }
 0x22c   :  { %2410 = vmatprep.subr.bf16.mxu1 %v3156_v35  ;;  %v2439_v35 = vpack.c.bf16 %v1519_v17, %v1518_v42 }
 0x22f   :  { %2412 = vmatpush3.bf16.msra.mxu1 %v3113_v45  ;;  %v1514_v45 = vld [vmem:[%s3327_s4 + $0x10] sm:$0xff] }
 0x230   :  { %2414 = vmatprep.subr.bf16.mxu1 %v3160_v52  ;;  %v1600_v52 = vld [vmem:[%s3328_s10] sm:$0xff] }
 0x233   :  { %2416 = vmatpush3.bf16.msra.mxu1 %v3123_v56  ;;  %v1515_v56 = vld [vmem:[%s3327_s4 + $0x18] sm:$0xff] }
 0x234   :  { %2418 = vmatprep.subr.bf16.mxu1 %v3164_v27  ;;  %v1601_v27 = vld [vmem:[%s3328_s10 + $0x8] sm:$0xff] }
 0x237   :  { %2420 = vmatpush3.bf16.msra.mxu1 %v3130_v33  ;;  %v2433_v33 = vpack.c.bf16 %v1515_v56, %v1514_v45 }
 0x238   :  { %2422 = vmatprep.subr.bf16.mxu1 %v3168_v41  ;;  %v2442_v41 = vpack.c.bf16 %v1601_v27, %v1600_v52 }
 0x23b   :  { %2424 = vmatpush3.bf16.msra.mxu1 %v3138_v20  ;;  %v1516_v20 = vld [vmem:[%s3327_s4 + $0x20] sm:$0xff] }
 0x23c   :  { %2426 = vmatprep.subr.bf16.mxu1 %v3172_v19  ;;  %v1602_v19 = vld [vmem:[%s3328_s10 + $0x10] sm:$0xff] }
 0x23d   :  { %v2445_v32 = vpack.c.bf16 %v1603_v53, %v1602_v19 }
 0x23f   :  { %2428 = vmatpush3.bf16.msra.mxu1 %v3140_v43  ;;  %v1517_v43 = vld [vmem:[%s3327_s4 + $0x28] sm:$0xff] }
 0x240   :  { %2429 = vmatprep.subr.bf16.mxu1 %v2564_v36  ;;  %v2436_v26 = vpack.c.bf16 %v1517_v43, %v1516_v20 }
 0x242   :  { %1506 = vmatmul.mubr.f32.vlgmr.msra.gmra.mrb[20].mxu1 %v1439_v50 }
 0x243   :  { %2431 = vmatpush3.bf16.msra.mxu1 %v2430_v25  ;;  %2317 = vmatprep.mubr.msk.f32.mxu1 %vm2565_vm1, %v2566_v40 }
 0x244   :  { %2432 = vmatprep.subr.bf16.mxu1 %v2564_v36 }
 0x247   :  { %2434 = vmatpush3.bf16.msra.mxu1 %v2433_v33 }
 0x248   :  { %2435 = vmatprep.subr.bf16.mxu1 %v2564_v36 }
 0x24b   :  { %2437 = vmatpush3.bf16.msra.mxu1 %v2436_v26 }
 0x24c   :  { %2438 = vmatprep.subr.bf16.mxu1 %v2564_v36 }
 0x24f   :  { %2440 = vmatpush3.bf16.msra.mxu1 %v2439_v35 }
 0x250   :  { %2441 = vmatprep.subr.bf16.mxu1 %v2564_v36 }
 0x252   :  { %2318 = vmatmul.mubr.msk.f32.vlgmr.msra.gmra.mrb[22].mxu1 %vm166_vm0, %v3174_v24  ;;  %v1717_v24 = vpop.permute.xlu0 %1716 }
 0x253   :  { %2443 = vmatpush3.bf16.msra.mxu1 %v2442_v41  ;;  %2328 = vmatprep.mubr.msk.f32.mxu1 %vm2565_vm1, %v2566_v40 }
 0x254   :  { %2444 = vmatprep.subr.bf16.mxu1 %v2564_v36 }
 0x257   :  { %2446 = vmatpush3.bf16.msra.mxu1 %v2445_v32 }
 0x258   :  { %2447 = vmatprep.subr.bf16.mxu1 %v2564_v36 }
 0x2f5   :  { %v730_v34 = vpop.f32.mrb[2].mxu1 }
 0x2f6   :  { %1801 = vrot.lane.b32.xlu1 %v730_v34, %s2568_s9  ;;  %v2300_v61 = vpop.f32.mrb[3].mxu1  ;;  %2329 = vmatmul.mubr.msk.f32.vlgmr.msra.gmra.mrb[24].mxu1 %vm1611_vm2, %v730_v34 }
 0x2f7   :  { %2449 = vmatpush3.bf16.msra.mxu1 %v2430_v25  ;;  %2347 = vmatprep.mubr.msk.f32.mxu1 %vm2565_vm1, %v2566_v40 }
 0x2f8   :  { %2450 = vmatprep.subr.bf16.mxu1 %v2564_v36 }
 0x2fb   :  { %2452 = vmatpush3.bf16.msra.mxu1 %v2433_v33 }
 0x2fc   :  { %2453 = vmatprep.subr.bf16.mxu1 %v2564_v36 }
 0x2ff   :  { %2455 = vmatpush3.bf16.msra.mxu1 %v2436_v26 }
 0x300   :  { %2456 = vmatprep.subr.bf16.mxu1 %v2564_v36 }
 0x303   :  { %2458 = vmatpush3.bf16.msra.mxu1 %v2439_v35 }
 0x304   :  { %2459 = vmatprep.subr.bf16.mxu1 %v2564_v36 }
 0x306   :  { %2348 = vmatmul.mubr.msk.f32.vlgmr.msra.gmra.mrb[26].mxu1 %vm166_vm0, %v1717_v24 }
 0x307   :  { %2461 = vmatpush3.bf16.msra.mxu1 %v2442_v41  ;;  %2358 = vmatprep.mubr.msk.f32.mxu1 %vm2565_vm1, %v2566_v40 }
 0x308   :  { %2462 = vmatprep.subr.bf16.mxu1 %v2564_v36  ;;  %v1968_v36 = vld [vmem:[%s3331_s11] ss:$0 sm:$0xff] }
 0x30b   :  { %2464 = vmatpush3.bf16.msra.mxu1 %v2445_v32 }
 0x315   :  { %v2168_v54 = vpop.f32.mrb[20].mxu1 }
 0x316   :  { %v2169_v59 = vpop.f32.mrb[21].mxu1 }
 0x317   :  { %v2170_v62 = vadd.f32 %v2169_v59, %v2168_v54 }
 0x319   :  { %v1694_v63 = vadd.f32 %v2170_v62, %v1693_v28 }
 0x325   :  { %v1596_v31 = vpop.f32.mrb[22].mxu1 }
 0x326   :  { %v1597_v12 = vadd.f32 %v1966_v60, %v1596_v31  ;;  %v2319_v37 = vpop.f32.mrb[23].mxu1 }
 0x328   :  { %1686 = vst.msk [vmem:[%s3330_s17] sm:$0xff] %vm1685_vm3, %v1597_v12 }
 0x368   :  { %v1802_v40 = vpop.permute.xlu1 %1801 }
 0x369   :  { %2359 = vmatmul.mubr.msk.f32.vlgmr.msra.gmra.mrb[28].mxu1 %vm1611_vm2, %v1802_v40 }
 0x3c9   :  { %v1681_v15 = vpop.f32.mrb[24].mxu1 }
 0x3ca   :  { %v1682_v1 = vadd.f32 %v1968_v36, %v1681_v15  ;;  %v2330_v46 = vpop.f32.mrb[25].mxu1 }
 0x3cc   :  { %1688 = vrot.lane.b32.xlu0 %v1682_v1, %s2569_s5 }
 0x3d0   :  { %1696 = vrot.lane.b32.xlu0 %v1694_v63, %s2570_s30 }
 0x3d9   :  { %v1786_v47 = vpop.f32.mrb[26].mxu1 }
 0x3da   :  { %v1787_v2 = vadd.f32 %v1966_v60, %v1786_v47  ;;  %v2349_v21 = vpop.f32.mrb[27].mxu1 }
 0x3dc   :  { %1875 = vst.msk [vmem:[%s3330_s17 + $0x8] sm:$0xff] %vm1685_vm3, %v1787_v2 }
 0x43c   :  { %v1871_v51 = vpop.f32.mrb[28].mxu1 }
 0x43d   :  { %v1872_v0 = vadd.f32 %v1968_v36, %v1871_v51  ;;  %v2360_v39 = vpop.f32.mrb[29].mxu1 }
 0x43e   :  { %v1689_v22 = vpop.permute.xlu0 %1688 }
 0x43f   :  { %1692 = vst.msk [vmem:[%s3330_s17] sm:$0xff] %vm1691_vm4, %v1689_v22  ;;  %1877 = vrot.lane.b32.xlu1 %v1872_v0, %s2569_s5 }
 0x442   :  { %v1697_v57 = vpop.permute.xlu0 %1696 }
 0x443   :  { %1881 = vrot.lane.b32.xlu1 %v1694_v63, %s2569_s5  ;;  %1700 = vst.msk [vmem:[%s3330_s17] sm:$0xff] %vm1699_vm5, %v1697_v57 }
 0x4b1   :  { %v1878_v38 = vpop.permute.xlu1 %1877 }
 0x4b2   :  { %1880 = vst.msk [vmem:[%s3330_s17 + $0x8] sm:$0xff] %vm1691_vm4, %v1878_v38 }
 0x4b5   :  { %v1882_v13 = vpop.permute.xlu1 %1881 }
 0x4b6   :  { %1884 = vst.msk [vmem:[%s3330_s17 + $0x8] sm:$0xff] %vm1699_vm5, %v1882_v13 }

</bundles_post_ra>
